<compile_context>
chip_gen: v6e
topology: v6e:2x2x1
jax: 0.10.0
libtpu: 0.0.40
codegen_flags: <defaults>
</compile_context>

<pallas_src>
import functools

import jax
import jax.numpy as jnp
from jax.experimental import pallas as pl
from jax.experimental.pallas import tpu as pltpu


def _round_up(x, m):
    return (x + m - 1) // m * m


def _num_tensorcores():
    """Best-effort count of TensorCores Mosaic can shard a 'parallel' grid
    axis over (v7x and v4/v5p megacore expose 2; v5e/v6e expose 1)."""
    try:
        kind = jax.devices()[0].device_kind.lower()
    except Exception:
        return 1
    return 2 if any(tag in kind for tag in ("v7", "v4", "v5p")) else 1


def _batch_tiling(B, num_cores):
    """Pick (tile_b, padded_B, grid_len) for the batch axis.

    Single-TC parts: one grid step whenever possible (block == full batch, so
    no batch padding at all).  Dual-TC parts: >=256-row batches are split into
    num_cores tiles so both cores are fed.  Tiles are capped at 1024 rows
    (working set stays < ~6 MiB, far under every generation's VMEM)."""
    MAX_TILE = 1024
    if B <= MAX_TILE and (num_cores == 1 or B < 256):
        return B, B, 1
    ntiles = num_cores
    while _round_up(pl.cdiv(B, ntiles), 8) > MAX_TILE:
        ntiles += num_cores
    tile_b = _round_up(pl.cdiv(B, ntiles), 8)
    Bp = _round_up(B, tile_b)
    return tile_b, Bp, Bp // tile_b


def _dqn_mlp_kernel(x_ref, w1_ref, b1_ref, w2_ref, b2_ref, w3_ref, b3_ref, o_ref):
    # Cast x to the weight dtype here (cheap VPU cast) so the wrapper never
    # launches a separate convert/pad kernel for the activations.
    x = x_ref[...].astype(w1_ref.dtype)
    # Layer 1: x @ W1 + b1, ReLU   (bf16 operands, f32 accumulation)
    h1 = jnp.dot(x, w1_ref[...], preferred_element_type=jnp.float32)
    h1 = jnp.maximum(h1 + b1_ref[...], 0.0).astype(w2_ref.dtype)
    # Layer 2: h1 @ W2 + b2, ReLU
    h2 = jnp.dot(h1, w2_ref[...], preferred_element_type=jnp.float32)
    h2 = jnp.maximum(h2 + b2_ref[...], 0.0).astype(w3_ref.dtype)
    # Layer 3: h2 @ W3 + b3 (Q-values, no activation)
    out = jnp.dot(h2, w3_ref[...], preferred_element_type=jnp.float32)
    o_ref[...] = (out + b3_ref[...]).astype(o_ref.dtype)


def prepare_params(params, compute_dtype=jnp.bfloat16):
    """One-time conversion of PyTorch-convention params (W: [out, in], b: [out])
    into kernel-ready layout: transposed to [in, out], hidden/output (lane) dims
    zero-padded to 128, weights cast to `compute_dtype`.  The layer-1
    contraction axis is left at the true n_states (the kernel block equals the
    full array, so no 8-alignment / padding is required there).  Biases stay
    f32 and are added to the f32 accumulator.  Call once, reuse every forward."""
    w1, w2, w3 = params["w1"], params["w2"], params["w3"]
    b1, b2, b3 = params["b1"], params["b2"], params["b3"]

    h1_dim, h2_dim = w1.shape[0], w2.shape[0]
    n_actions = w3.shape[0]

    H1p = _round_up(h1_dim, 128)
    H2p = _round_up(h2_dim, 128)
    Ap = _round_up(n_actions, 128)

    def pad_w(w, rows, cols):
        wt = w.T.astype(compute_dtype)                      # [in, out]
        return jnp.pad(wt, ((0, rows - wt.shape[0]), (0, cols - wt.shape[1])))

    def pad_b(b, cols):
        return jnp.pad(b.astype(jnp.float32), (0, cols - b.shape[0]))[None, :]

    return {
        "w1": pad_w(w1, w1.shape[1], H1p), "b1": pad_b(b1, H1p),   # no K padding
        "w2": pad_w(w2, H1p, H2p), "b2": pad_b(b2, H2p),
        "w3": pad_w(w3, H2p, Ap), "b3": pad_b(b3, Ap),
    }


@functools.partial(jax.jit, static_argnames=("n_actions",))
def dqn_forward(x, kparams, n_actions):
    """x: [B, n_states] float32.  kparams: output of prepare_params.
    Returns [B, n_actions] float32 Q-values."""
    w1p, b1p = kparams["w1"], kparams["b1"]
    w2p, b2p = kparams["w2"], kparams["b2"]
    w3p, b3p = kparams["w3"], kparams["b3"]

    B, n_states = x.shape
    S, H1p = w1p.shape            # S == true n_states (unpadded contraction)
    H2p = w2p.shape[1]
    Ap = w3p.shape[1]
    assert S == n_states

    num_cores = _num_tensorcores()
    tile_b, Bp, grid_n = _batch_tiling(B, num_cores)

    # Only pad the batch when a multi-tile grid forces it (never for the
    # single-step inference path, and never on the feature dim).
    xk = x if Bp == B else jnp.pad(x, ((0, Bp - B), (0, 0)))

    out_padded = pl.pallas_call(
        _dqn_mlp_kernel,
        out_shape=jax.ShapeDtypeStruct((Bp, Ap), jnp.float32),
        grid=(grid_n,),
        in_specs=[
            pl.BlockSpec((tile_b, S), lambda i: (i, 0)),    # x: tiled over batch
            pl.BlockSpec((S, H1p), lambda i: (0, 0)),       # weights/biases stay
            pl.BlockSpec((1, H1p), lambda i: (0, 0)),       # VMEM-resident across
            pl.BlockSpec((H1p, H2p), lambda i: (0, 0)),     # the batch grid
            pl.BlockSpec((1, H2p), lambda i: (0, 0)),
            pl.BlockSpec((H2p, Ap), lambda i: (0, 0)),
            pl.BlockSpec((1, Ap), lambda i: (0, 0)),
        ],
        out_specs=pl.BlockSpec((tile_b, Ap), lambda i: (i, 0)),
        compiler_params=pltpu.CompilerParams(
            dimension_semantics=("parallel",)),
    )(xk, w1p, b1p, w2p, b2p, w3p, b3p)

    return out_padded[:B, :n_actions]


def init_dqn_params(key, n_states, n_actions):
    """Deterministic init mimicking PyTorch nn.Linear default
    (uniform(-1/sqrt(fan_in), 1/sqrt(fan_in))); PyTorch convention W:[out,in]."""
    dims = [(200, n_states), (100, 200), (n_actions, 100)]
    params = {}
    for i, (out_f, in_f) in enumerate(dims, start=1):
        key, kw, kb = jax.random.split(key, 3)
        bound = 1.0 / (in_f ** 0.5)
        params[f"w{i}"] = jax.random.uniform(
            kw, (out_f, in_f), jnp.float32, -bound, bound)
        params[f"b{i}"] = jax.random.uniform(
            kb, (out_f,), jnp.float32, -bound, bound)
    return params


if __name__ == "__main__":
    n_states, n_actions = 4, 2   # CartPole

    key = jax.random.PRNGKey(0)
    kp, kx, kx2, kx3 = jax.random.split(key, 4)
    params = init_dqn_params(kp, n_states, n_actions)

    # One-time kernel-ready param prep (hoisted out of the per-call path).
    kparams = jax.tree.map(jax.block_until_ready, prepare_params(params))

    # Pure-JAX f32 reference.
    def ref(x, p):
        h = jnp.maximum(x @ p["w1"].T + p["b1"], 0.0)
        h = jnp.maximum(h @ p["w2"].T + p["b2"], 0.0)
        return h @ p["w3"].T + p["b3"]

    # bf16 weights/activations with f32 accumulation -> loosened tolerance.
    def check(x):
        q = jax.block_until_ready(dqn_forward(x, kparams, n_actions))
        q_ref = ref(x, params)
        assert q.shape == (x.shape[0], n_actions)
        assert jnp.allclose(q, q_ref, atol=5e-2, rtol=5e-2), (q, q_ref)

    # 1) Small inference-style batch: single grid step, zero padding anywhere.
    check(jax.random.normal(kx, (2, n_states), jnp.float32))
    # 2) Awkward replay batch (not a multiple of 128): no wasted tail tile.
    check(jax.random.normal(kx2, (200, n_states), jnp.float32))
    # 3) Large batch: exercises the multi-step / multi-core tiled path.
    check(jax.random.normal(kx3, (1280, n_states), jnp.float32))

    # TODO(synk): training-side pieces (target-net forward fused in the same
    # pallas_call, gather(Q, action), Huber/TD loss, Adam, replay buffer) are
    # outside this module's forward and are not implemented as kernels.
    print("KERNEL_OK")
</pallas_src>

<mosaic_0001>
module attributes {stable_mosaic.version = 11 : i64} {
  func.func @_dqn_mlp_kernel(%arg0: i32, %arg1: memref<2x4xf32, #tpu.memory_space<vmem>>, %arg2: memref<4x256xbf16, #tpu.memory_space<vmem>>, %arg3: memref<1x256xf32, #tpu.memory_space<vmem>>, %arg4: memref<256x128xbf16, #tpu.memory_space<vmem>>, %arg5: memref<1x128xf32, #tpu.memory_space<vmem>>, %arg6: memref<128x128xbf16, #tpu.memory_space<vmem>>, %arg7: memref<1x128xf32, #tpu.memory_space<vmem>>, %arg8: memref<2x128xf32, #tpu.memory_space<vmem>>) attributes {dimension_semantics = [#tpu.dimension_semantics<parallel>], iteration_bounds = array<i64: 1>, scalar_prefetch = 0 : i64, scratch_operands = 0 : i64, tpu.core_type = #tpu.core_type<tc>, window_params = [{transform_indices = @transform_0, window_bounds = array<i64: 2, 4>}, {pipeline_mode = #tpu.pipeline_mode<synchronous>, transform_indices = @transform_1, window_bounds = array<i64: 4, 256>}, {pipeline_mode = #tpu.pipeline_mode<synchronous>, transform_indices = @transform_2, window_bounds = array<i64: 1, 256>}, {pipeline_mode = #tpu.pipeline_mode<synchronous>, transform_indices = @transform_3, window_bounds = array<i64: 256, 128>}, {pipeline_mode = #tpu.pipeline_mode<synchronous>, transform_indices = @transform_4, window_bounds = array<i64: 1, 128>}, {pipeline_mode = #tpu.pipeline_mode<synchronous>, transform_indices = @transform_5, window_bounds = array<i64: 128, 128>}, {pipeline_mode = #tpu.pipeline_mode<synchronous>, transform_indices = @transform_6, window_bounds = array<i64: 1, 128>}, {transform_indices = @transform_7, window_bounds = array<i64: 2, 128>}]} {
    %c0 = arith.constant 0 : index
    %c0_0 = arith.constant 0 : index
    %0 = vector.load %arg1[%c0, %c0_0] : memref<2x4xf32, #tpu.memory_space<vmem>>, vector<2x4xf32>
    %1 = arith.truncf %0 : vector<2x4xf32> to vector<2x4xbf16>
    %c0_1 = arith.constant 0 : index
    %c0_2 = arith.constant 0 : index
    %2 = vector.load %arg2[%c0_1, %c0_2] : memref<4x256xbf16, #tpu.memory_space<vmem>>, vector<4x256xbf16>
    %cst = arith.constant dense<0.000000e+00> : vector<2x256xf32>
    %3 = tpu.matmul %1, %2, %cst {dimension_numbers = #tpu.dot_dimension_numbers<[1], [0], [0], [1], [0, 0, 1, 1], [], []>} : vector<2x4xbf16>, vector<4x256xbf16>, vector<2x256xf32> -> vector<2x256xf32>
    %c0_3 = arith.constant 0 : index
    %c0_4 = arith.constant 0 : index
    %4 = vector.load %arg3[%c0_3, %c0_4] : memref<1x256xf32, #tpu.memory_space<vmem>>, vector<1x256xf32>
    %5 = vector.broadcast %4 : vector<1x256xf32> to vector<2x256xf32>
    %6 = arith.addf %3, %5 : vector<2x256xf32>
    %cst_5 = arith.constant 0.000000e+00 : f32
    %7 = vector.broadcast %cst_5 : f32 to vector<2x256xf32>
    %8 = arith.maximumf %6, %7 : vector<2x256xf32>
    %9 = arith.truncf %8 : vector<2x256xf32> to vector<2x256xbf16>
    %c0_6 = arith.constant 0 : index
    %c0_7 = arith.constant 0 : index
    %10 = vector.load %arg4[%c0_6, %c0_7] : memref<256x128xbf16, #tpu.memory_space<vmem>>, vector<256x128xbf16>
    %cst_8 = arith.constant dense<0.000000e+00> : vector<2x128xf32>
    %11 = tpu.matmul %9, %10, %cst_8 {dimension_numbers = #tpu.dot_dimension_numbers<[1], [0], [0], [1], [0, 0, 1, 1], [], []>} : vector<2x256xbf16>, vector<256x128xbf16>, vector<2x128xf32> -> vector<2x128xf32>
    %c0_9 = arith.constant 0 : index
    %c0_10 = arith.constant 0 : index
    %12 = vector.load %arg5[%c0_9, %c0_10] : memref<1x128xf32, #tpu.memory_space<vmem>>, vector<1x128xf32>
    %13 = vector.broadcast %12 : vector<1x128xf32> to vector<2x128xf32>
    %14 = arith.addf %11, %13 : vector<2x128xf32>
    %cst_11 = arith.constant 0.000000e+00 : f32
    %15 = vector.broadcast %cst_11 : f32 to vector<2x128xf32>
    %16 = arith.maximumf %14, %15 : vector<2x128xf32>
    %17 = arith.truncf %16 : vector<2x128xf32> to vector<2x128xbf16>
    %c0_12 = arith.constant 0 : index
    %c0_13 = arith.constant 0 : index
    %18 = vector.load %arg6[%c0_12, %c0_13] : memref<128x128xbf16, #tpu.memory_space<vmem>>, vector<128x128xbf16>
    %cst_14 = arith.constant dense<0.000000e+00> : vector<2x128xf32>
    %19 = tpu.matmul %17, %18, %cst_14 {dimension_numbers = #tpu.dot_dimension_numbers<[1], [0], [0], [1], [0, 0, 1, 1], [], []>} : vector<2x128xbf16>, vector<128x128xbf16>, vector<2x128xf32> -> vector<2x128xf32>
    %c0_15 = arith.constant 0 : index
    %c0_16 = arith.constant 0 : index
    %20 = vector.load %arg7[%c0_15, %c0_16] : memref<1x128xf32, #tpu.memory_space<vmem>>, vector<1x128xf32>
    %21 = vector.broadcast %20 : vector<1x128xf32> to vector<2x128xf32>
    %22 = arith.addf %19, %21 : vector<2x128xf32>
    %c0_17 = arith.constant 0 : index
    %c0_18 = arith.constant 0 : index
    %23 = vector.load %arg8[%c0_17, %c0_18] : memref<2x128xf32, #tpu.memory_space<vmem>>, vector<2x128xf32>
    tpu.vector_store %arg8[%c0_17, %c0_18], %22 {strides = array<i32>} : memref<2x128xf32, #tpu.memory_space<vmem>>, vector<2x128xf32>,
    return
  }
  func.func @transform_0(%arg0: i32) -> (i32, i32) {
    %c0_i32 = arith.constant 0 : i32
    %c0_i32_0 = arith.constant 0 : i32
    return %arg0, %c0_i32 : i32, i32
  }
  func.func @transform_1(%arg0: i32) -> (i32, i32) {
    %c0_i32 = arith.constant 0 : i32
    %c0_i32_0 = arith.constant 0 : i32
    %c0_i32_1 = arith.constant 0 : i32
    return %c0_i32, %c0_i32_0 : i32, i32
  }
  func.func @transform_2(%arg0: i32) -> (i32, i32) {
    %c0_i32 = arith.constant 0 : i32
    %c0_i32_0 = arith.constant 0 : i32
    %c0_i32_1 = arith.constant 0 : i32
    return %c0_i32, %c0_i32_0 : i32, i32
  }
  func.func @transform_3(%arg0: i32) -> (i32, i32) {
    %c0_i32 = arith.constant 0 : i32
    %c0_i32_0 = arith.constant 0 : i32
    %c0_i32_1 = arith.constant 0 : i32
    return %c0_i32, %c0_i32_0 : i32, i32
  }
  func.func @transform_4(%arg0: i32) -> (i32, i32) {
    %c0_i32 = arith.constant 0 : i32
    %c0_i32_0 = arith.constant 0 : i32
    %c0_i32_1 = arith.constant 0 : i32
    return %c0_i32, %c0_i32_0 : i32, i32
  }
  func.func @transform_5(%arg0: i32) -> (i32, i32) {
    %c0_i32 = arith.constant 0 : i32
    %c0_i32_0 = arith.constant 0 : i32
    %c0_i32_1 = arith.constant 0 : i32
    return %c0_i32, %c0_i32_0 : i32, i32
  }
  func.func @transform_6(%arg0: i32) -> (i32, i32) {
    %c0_i32 = arith.constant 0 : i32
    %c0_i32_0 = arith.constant 0 : i32
    %c0_i32_1 = arith.constant 0 : i32
    return %c0_i32, %c0_i32_0 : i32, i32
  }
  func.func @transform_7(%arg0: i32) -> (i32, i32) {
    %c0_i32 = arith.constant 0 : i32
    %c0_i32_0 = arith.constant 0 : i32
    return %arg0, %c0_i32 : i32, i32
  }
}

</mosaic_0001>

<bundles_post_ra>
// kernel: dqn_forward.1
= control target key start
LH: loop header
LB: loop body
LE: loop exit
PB: predicated region body
PF: predicated region fallthrough
CT: control target
= control target key end

     0   :  { %12 = vsyncpa [#allocation3], 0  ;;  %s761_s0 = inlined_call_operand.hbm [shape: f32[2,4], index: 0, kind: input, shape index: {}]   ;;  %s762_s1 = inlined_call_operand.vmem [shape: bf16[4,256], index: 1, kind: input, shape index: {}]   ;;  %s763_s2 = inlined_call_operand.hbm [shape: f32[1,256], index: 2, kind: input, shape index: {}]   ;;  %s764_s3 = inlined_call_operand.hbm [shape: bf16[256,128], index: 3, kind: input, shape index: {}]   ;;  %s765_s4 = inlined_call_operand.vmem [shape: f32[1,128], index: 4, kind: input, shape index: {}]   ;;  %s766_s5 = inlined_call_operand.hbm [shape: bf16[128,128], index: 5, kind: input, shape index: {}]   ;;  %s767_s6 = inlined_call_operand.vmem [shape: f32[1,128], index: 6, kind: input, shape index: {}]   ;;  %s768_s7 = inlined_call_operand.hbm [shape: f32[2,128], index: 7, kind: output, shape index: {}]  }
   0x1   :  { %13 = vsyncpa [#allocation6], 0 }
   0x2   :  { %14 = vsyncpa [#allocation9], 0 }
   0x3   :  { %15 = vsyncpa [#allocation4], 0  ;;  %s687_s24 = smov [#allocation5]   ;;  %s688_s26 = smov [#allocation2]  }
   0x4   :  { %s34_s25 = sshll.u32 %s687_s24, 4  ;;  %s22_s27 = sshll.u32 %s688_s26, 4  ;;  %s35_s25 = int_to_ptr.vmem [resolvable:$true] %s34_s25  ;;  %s23_s27 = int_to_ptr.vmem [resolvable:$true] %s22_s27 }
   0x5   :  { %s587_s28 = scalar_lea.vmem %s35_s25, 32  ;;  %p592_p1 = scmp.lt.s32.totalorder %s35_s25, %s35_s25 }
   0x6   :  { %p588_p0 = scmp.ne.s32.totalorder %s35_s25, %s587_s28  ;;  %p593_p2 = scmp.lt.s32.totalorder %s587_s28, %s587_s28 }
   0x8   :  { %p594_p3 = por %p593_p2, %p592_p1 }
   0xa   :  { %p595_p4 = pnand %p594_p3, %p588_p0 }
   0xc   :  { %598 = shalt.err (!%p595_p4)
}
   0xd   :  { %37 = dma.hbm_to_vmem [thread:$0]  %s763_s2, 32, %s35_s25, [#allocation6]  }
   0xe   :  { %s607_s8 = scalar_lea.vmem %s23_s27, 32  ;;  %p612_p6 = scmp.lt.s32.totalorder %s23_s27, %s23_s27 }
   0xf   :  { %p608_p5 = scmp.ne.s32.totalorder %s23_s27, %s607_s8  ;;  %p613_p7 = scmp.lt.s32.totalorder %s607_s8, %s607_s8 }
  0x11   :  { %p614_p8 = por %p613_p7, %p612_p6 }
  0x13   :  { %p615_p9 = pnand %p614_p8, %p608_p5 }
  0x15   :  { %618 = shalt.err (!%p615_p9)
}
  0x16   :  { %25 = dma.hbm_to_vmem [thread:$0]  %s761_s0, 32, %s23_s27, [#allocation3]  }
  0x17   :  { %s689_s11 = smov [#allocation7]  }
  0x18   :  { %s43_s12 = sshll.u32 %s689_s11, 4  ;;  %s44_s12 = int_to_ptr.vmem [resolvable:$true] %s43_s12 }
  0x19   :  { %s627_s13 = scalar_lea.vmem %s44_s12, 2048  ;;  %p632_p11 = scmp.lt.s32.totalorder %s44_s12, %s44_s12 }
  0x1a   :  { %p628_p10 = scmp.ne.s32.totalorder %s44_s12, %s627_s13  ;;  %p633_p12 = scmp.lt.s32.totalorder %s627_s13, %s627_s13 }
  0x1c   :  { %p634_p13 = por %p633_p12, %p632_p11 }
  0x1e   :  { %p635_p0 = pnand %p634_p13, %p628_p10 }
  0x20   :  { %638 = shalt.err (!%p635_p0)
}
  0x21   :  { %s690_s2 = smov 64   ;;  %s691_s14 = smov 4  }
  0x22   :  { %49 = dma.hbm_to_vmem [thread:$0]  %s764_s3, 2048, %s44_s12, [#allocation6], %s690_s2, %s690_s2, %s691_s14  }
  0x23   :  { %s692_s17 = smov [#allocation8]  }
  0x24   :  { %s57_s18 = sshll.u32 %s692_s17, 4  ;;  %s58_s18 = int_to_ptr.vmem [resolvable:$true] %s57_s18 }
  0x25   :  { %s647_s0 = scalar_lea.vmem %s58_s18, 1024  ;;  %p652_p2 = scmp.lt.s32.totalorder %s58_s18, %s58_s18 }
  0x26   :  { %p648_p1 = scmp.ne.s32.totalorder %s58_s18, %s647_s0  ;;  %p653_p3 = scmp.lt.s32.totalorder %s647_s0, %s647_s0 }
  0x28   :  { %p654_p4 = por %p653_p3, %p652_p2 }
  0x2a   :  { %p655_p5 = pnand %p654_p4, %p648_p1 }
  0x2c   :  { %658 = shalt.err (!%p655_p5)
}
  0x2d   :  { %63 = dma.hbm_to_vmem [thread:$0]  %s766_s5, 1024, %s58_s18, [#allocation9], %s690_s2, %s690_s2, %s691_s14  }
  0x2e   :  { %679 = dma.done.wait [#allocation3], 32  }
  0x2f   :  { %680 = vsyncadd [#allocation3], 4294967264 }
  0x30   :  { %681 = dma.done.wait [#allocation6], 2080  }
  0x31   :  { %682 = vsyncadd [#allocation6], 4294965216 }
  0x32   :  { %683 = dma.done.wait [#allocation9], 1024  }
  0x33   :  { %684 = vsyncadd [#allocation9], 4294966272  ;;  %v693_v0 = vmov 0   ;;  %vm107_vm0 = vcmask 1041408   ;;  %v79_v2 = vld [vmem:[#allocation2] sm:$0x3]  ;;  %v84_v28 = vlaneseq }
  0x34   :  { %146 = vmatprep.mubr.bf16.mxu0 %v693_v0  ;;  %v465_v1 = vld.sshfl [vmem:[%s762_s1] sm:$0x33 pattern:$0x76325410]  ;;  %v80_v7 = vpack.c.bf16 %v79_v2, %v79_v2  ;;  %v557_v8 = vld [vmem:[#allocation7 + $0x70] sm:$0xff]   ;;  %vm103_vm1 = vcmask 31744  }
  0x35   :  { %v102_v3 = vcombine.high %v465_v1, %v465_v1  ;;  %v109_v4 = vsel %vm107_vm0, %v465_v1, 0  ;;  %v555_v5 = vld [vmem:[#allocation7 + $0x78] sm:$0xff]   ;;  %v558_v9 = vld [vmem:[#allocation7 + $0x30] sm:$0xff]   ;;  %v559_v10 = vld [vmem:[#allocation7 + $0x68] sm:$0xff]   ;;  %v694_v23 = vmov 0.0   ;;  %v85_v29 = vshrl.u32 %v84_v28, 7 }
  0x36   :  { %v556_v6 = vld [vmem:[#allocation7 + $0x38] sm:$0xff]   ;;  %494 = vmatprep.subr.bf16.mxu1 %v555_v5  ;;  %v560_v11 = vld [vmem:[#allocation7 + $0x28] sm:$0xff]   ;;  %v561_v12 = vld [vmem:[#allocation7 + $0x60] sm:$0xff]   ;;  %vm695_vm2 = vmmov 0   ;;  %s696_s24 = smov [#allocation10]  }
  0x37   :  { %466 = vmatprep.subr.msk.bf16.mxu0 %vm107_vm0, %v102_v3  ;;  %495 = vmatpush3.bf16.msra.mxu1 %v556_v6  ;;  %v562_v13 = vld [vmem:[#allocation7 + $0x20] sm:$0xff]   ;;  %v563_v14 = vld [vmem:[#allocation7 + $0x58] sm:$0xff]   ;;  %v565_v16 = vld [vmem:[#allocation7 + $0x50] sm:$0xff]   ;;  %v86_v30 = vsub.s32 0, %v85_v29  ;;  %v90_v32 = vsub.s32 1, %v85_v29  ;;  %s454_s25 = sshll.u32 %s696_s24, 4  ;;  %s455_s25 = int_to_ptr.vmem [resolvable:$true] %s454_s25 }
  0x38   :  { %129 = vmatpush1.bf16.msra.mxu0 %v109_v4  ;;  %496 = vmatprep.subr.bf16.mxu1 %v557_v8  ;;  %v564_v15 = vld [vmem:[#allocation7 + $0x18] sm:$0xff]   ;;  %v566_v17 = vld [vmem:[#allocation7 + $0x10] sm:$0xff]   ;;  %v567_v18 = vld [vmem:[#allocation7 + $0x48] sm:$0xff]   ;;  %p664_p7 = scmp.lt.s32.totalorder %s455_s25, %s455_s25 }
  0x39   :  { %v568_v19 = vld [vmem:[#allocation7 + $0x8] sm:$0xff]   ;;  %v569_v20 = vld [vmem:[#allocation7 + $0x40] sm:$0xff]   ;;  %v571_v22 = vld [vmem:[#allocation8 + $0x38] sm:$0xff]   ;;  %525 = vmatprep.subr.bf16.mxu0 %v694_v23 }
  0x3a   :  { %v570_v21 = vld [vmem:[#allocation7] sm:$0xff]   ;;  %v572_v24 = vld [vmem:[#allocation8 + $0x30] sm:$0xff]   ;;  %v573_v25 = vld [vmem:[#allocation8 + $0x28] sm:$0xff]  }
  0x3b   :  { %467 = vmatmul.mubr.msk.bf16.vlgmr.msra.gmra.mxu0 %vm103_vm1, %v80_v7  ;;  %497 = vmatpush3.bf16.msra.mxu1 %v558_v9  ;;  %v574_v26 = vld [vmem:[#allocation8 + $0x20] sm:$0xff]   ;;  %v575_v27 = vld [vmem:[#allocation8 + $0x18] sm:$0xff]   ;;  %v576_v45 = vld [vmem:[#allocation8 + $0x10] sm:$0xff]  }
  0x3c   :  { %498 = vmatprep.subr.bf16.mxu1 %v559_v10  ;;  %526 = vmatpush3.bf16.msra.mxu0 %v571_v22  ;;  %v82_v31 = vld [vmem:[#allocation5] sm:$0x3]  ;;  %v577_v46 = vld [vmem:[#allocation8 + $0x8] sm:$0xff]   ;;  %v578_v47 = vld [vmem:[#allocation8] sm:$0xff]  }
  0x3d   :  { %527 = vmatprep.subr.bf16.mxu0 %v694_v23  ;;  %v87_v33 = vrot.slane %v82_v31, %v86_v30  ;;  %v91_v34 = vrot.slane %v82_v31, %v90_v32  ;;  %541 = vmatprep.mubr.msk.bf16.mxu0 %vm695_vm2, %v694_v23  ;;  %v468_v49 = vld [vmem:[%s765_s4] ss:$0 sm:$0xff]  ;;  %s659_s4 = scalar_lea.vmem %s455_s25, 32 }
  0x3e   :  { %v485_v57 = vld [vmem:[%s767_s6] ss:$0 sm:$0xff]  ;;  %p660_p6 = scmp.ne.s32.totalorder %s455_s25, %s659_s4  ;;  %p665_p8 = scmp.lt.s32.totalorder %s659_s4, %s659_s4 }
  0x3f   :  { %499 = vmatpush3.bf16.msra.mxu1 %v560_v11 }
  0x40   :  { %500 = vmatprep.subr.bf16.mxu1 %v561_v12  ;;  %528 = vmatpush3.bf16.msra.mxu0 %v572_v24  ;;  %p666_p9 = por %p665_p8, %p664_p7 }
  0x41   :  { %529 = vmatprep.subr.bf16.mxu0 %v694_v23 }
  0x42   :  { %p667_p10 = pnand %p666_p9, %p660_p6 }
  0x43   :  { %501 = vmatpush3.bf16.msra.mxu1 %v562_v13 }
  0x44   :  { %502 = vmatprep.subr.bf16.mxu1 %v563_v14  ;;  %530 = vmatpush3.bf16.msra.mxu0 %v573_v25 }
  0x45   :  { %531 = vmatprep.subr.bf16.mxu0 %v694_v23 }
  0x47   :  { %503 = vmatpush3.bf16.msra.mxu1 %v564_v15 }
  0x48   :  { %504 = vmatprep.subr.bf16.mxu1 %v565_v16  ;;  %532 = vmatpush3.bf16.msra.mxu0 %v574_v26 }
  0x49   :  { %533 = vmatprep.subr.bf16.mxu0 %v694_v23 }
  0x4b   :  { %505 = vmatpush3.bf16.msra.mxu1 %v566_v17 }
  0x4c   :  { %506 = vmatprep.subr.bf16.mxu1 %v567_v18  ;;  %534 = vmatpush3.bf16.msra.mxu0 %v575_v27 }
  0x4d   :  { %535 = vmatprep.subr.bf16.mxu0 %v694_v23 }
  0x4f   :  { %507 = vmatpush3.bf16.msra.mxu1 %v568_v19 }
  0x50   :  { %508 = vmatprep.subr.bf16.mxu1 %v569_v20  ;;  %536 = vmatpush3.bf16.msra.mxu0 %v576_v45 }
  0x51   :  { %537 = vmatprep.subr.bf16.mxu0 %v694_v23 }
  0x53   :  { %509 = vmatpush3.bf16.msra.mxu1 %v570_v21 }
  0x54   :  { %538 = vmatpush3.bf16.msra.mxu0 %v577_v46 }
  0x55   :  { %539 = vmatprep.subr.bf16.mxu0 %v694_v23 }
  0x58   :  { %540 = vmatpush3.bf16.msra.mxu0 %v578_v47 }
  0xfb   :  { %v148_v35 = vpop.f32.mrf.mxu0 }
  0xfc   :  { %v149_v36 = vadd.f32 %v148_v35, %v87_v33 }
  0xfd   :  { %v150_v37 = vpop.f32.mrf.mxu0 }
  0xfe   :  { %v151_v38 = vadd.f32 %v150_v37, %v91_v34  ;;  %v155_v39 = vmax.f32 %v149_v36, 0.0 }
  0xff   :  { %v152_v40 = vpop.f32.mrf.mxu0 }
 0x100   :  { %v156_v41 = vmax.f32 %v151_v38, 0.0  ;;  %v157_v44 = vpack.c.bf16 %v155_v39, %v155_v39 }
 0x101   :  { %v153_v42 = vpop.f32.mrf.mxu0 }
 0x102   :  { %v158_v43 = vpack.c.bf16 %v156_v41, %v156_v41 }
 0x104   :  { %326 = vmatprep.mubr.bf16.mxu1 %v158_v43 }
 0x105   :  { %327 = vmatmul.mubr.bf16.vlgmr.msra.gmra.mxu1 %v157_v44 }
 0x1c5   :  { %v510_v48 = vpop.f32.mrf.mxu1 }
 0x1c7   :  { %v511_v50 = vpop.f32.mrf.mxu1 }
 0x1c8   :  { %v512_v51 = vadd.f32 %v511_v50, %v510_v48 }
 0x1c9   :  { %v513_v52 = vpop.f32.mrf.mxu1 }
 0x1ca   :  { %v329_v53 = vadd.f32 %v512_v51, %v468_v49 }
 0x1cb   :  { %v514_v54 = vpop.f32.mrf.mxu1 }
 0x1cc   :  { %v334_v55 = vmax.f32 %v329_v53, 0.0 }
 0x1ce   :  { %v335_v56 = vpack.c.bf16 %v334_v55, %v334_v55 }
 0x1d0   :  { %542 = vmatmul.mubr.bf16.vlgmr.msra.gmra.mxu0 %v335_v56 }
 0x290   :  { %v441_v58 = vpop.f32.mrf.mxu0 }
 0x291   :  { %v442_v59 = vadd.f32 %v485_v57, %v441_v58 }
 0x292   :  { %v543_v60 = vpop.f32.mrf.mxu0 }
 0x293   :  { %447 = vst [vmem:[#allocation10] sm:$0x3] %v442_v59 }
 0x294   :  { %v444_v61 = vpop.f32.mrf.mxu0 }
 0x295   :  { %670 = shalt.err (!%p667_p10)
}
 0x296   :  { %457 = dma.vmem_to_hbm [thread:$0]  %s455_s25, 32, %s768_s7, [#allocation4]   ;;  %v544_v62 = vpop.f32.mrf.mxu0 }
 0x297   :  { %685 = dma.done.wait [#allocation4], 32  }
 0x298   :  { %686 = vsyncadd [#allocation4], 4294967264 }
 0x299   :  { %461 = vsyncpa [#allocation3], 1 }
 0x29a   :  { %462 = vsyncpa [#allocation6], 1 }
 0x29b   :  { %463 = vsyncpa [#allocation9], 1 }
 0x29c   :  { %464 = vsyncpa [#allocation4], 1 }

</bundles_post_ra>
